<compile_context>
chip_gen: v5e
topology: v5e:2x2
jax: 0.10.0
libtpu: 0.0.40
codegen_flags: <defaults>
</compile_context>

<pallas_src>
import math

import jax
import jax.numpy as jnp
from jax.experimental import pallas as pl
from jax.experimental.pallas import tpu as pltpu


_SQRT_2_OVER_PI = math.sqrt(2.0 / math.pi)


def _gelu_tanh(x):
    # matches torch.nn.functional.gelu(..., approximate='tanh'), f32 math
    return 0.5 * x * (1.0 + jnp.tanh(_SQRT_2_OVER_PI * (x + 0.044715 * x * x * x)))


def _gated_ff_kernel(x_ref, wi_ref, wo_ref, o_ref, acc_ref):
    """One (tm, D) token tile x one tf slice of the ff dimension.

    x_ref : (tm, D)     bf16
    wi_ref: (D, 2*tf)   bf16   [wi_0 tile | wi_1 tile] interleaved per F tile
    wo_ref: (tf, D)     bf16
    o_ref : (tm, D)     output dtype
    acc_ref: (tm, D)    f32 scratch, persists across the F (reduction) axis
    """
    j = pl.program_id(1)
    tf = wo_ref.shape[0]

    @pl.when(j == 0)
    def _():
        acc_ref[...] = jnp.zeros_like(acc_ref)

    # Single fused MXU pass for both input projections -> (tm, 2*tf) f32.
    hh = jnp.dot(x_ref[...], wi_ref[...], preferred_element_type=jnp.float32)
    # Gated GELU in f32 (VPU/EUP); lane-aligned halves (tf % 128 == 0).
    h = _gelu_tanh(hh[:, :tf]) * hh[:, tf:]

    acc_ref[...] += jnp.dot(h.astype(jnp.bfloat16), wo_ref[...],
                            preferred_element_type=jnp.float32)

    @pl.when(j == pl.num_programs(1) - 1)
    def _():
        o_ref[...] = acc_ref[...].astype(o_ref.dtype)


def _cdiv(a, b):
    return -(-a // b)


def _round_up(n, m):
    return ((n + m - 1) // m) * m


def _vmem_budget_bytes():
    """Usable VMEM per generation, leaving headroom for compiler scratch."""
    cap = 64 << 20                       # conservative fallback (v7x physical)
    try:
        info = pltpu.get_tpu_info()
        c = getattr(info, "vmem_capacity_bytes", None)
        if c:
            cap = int(c)
    except Exception:
        pass
    # ~25% headroom: v7x 64 MiB -> 48 MiB, v5e/v6e 128 MiB -> 96 MiB.
    return max(16 << 20, cap - max(cap // 4, 8 << 20))


def t5_dense_gated_act_dense(x, wi0, wi1, wo, *, tm_cap=512):
    """x: [..., D]; wi0, wi1: [D, F]; wo: [F, D] (weights stored as [in, out])."""
    orig_shape = x.shape
    D = orig_shape[-1]
    F = wi0.shape[1]
    assert wi0.shape == (D, F) and wi1.shape == (D, F) and wo.shape == (F, D)

    M = 1
    for s in orig_shape[:-1]:
        M *= s
    out_dtype = x.dtype

    budget = _vmem_budget_bytes()

    # ---- token (M) tiling: tm multiple of 16 (bf16 sublane packing); large M
    # gets big tiles (~tm_cap) and at least 2 tiles so v7x megacore is used. --
    if M <= 32:
        tm = _round_up(max(M, 8), 16)
    else:
        grid_m_target = max(2, _cdiv(M, tm_cap))
        tm = _round_up(_cdiv(M, grid_m_target), 16)
    # Keep per-M-tile fixed buffers (x dbuf bf16 + out dbuf f32 + f32 acc)
    # within roughly a third of the VMEM budget.
    while tm > 32 and 16 * tm * D > budget // 3:
        tm = max(16, _round_up(tm // 2, 16))
    grid_m = _cdiv(M, tm)
    M_pad = tm * grid_m

    # ---- ff (F) tiling: lane-aligned (256 preferred for v6e/v7x MXU), as
    # large as the VMEM budget allows, accounting for the (tm, tf)
    # intermediates.  If the whole (padded) F fits, grid_f == 1 and the weight
    # blocks are DMA'd exactly once for the entire call. ----
    lane = 256 if F >= 256 else 128
    F_aligned = _round_up(F, lane)
    fixed = 16 * tm * D + (2 << 20)          # x dbuf + out dbuf + acc + slack
    per_tf = 12 * D + 16 * tm                # wi/wo double-buffers + f32/bf16 intermediates
    tf_cap = max(lane, ((budget - fixed) // per_tf) // lane * lane)
    tf_cap = min(tf_cap, F_aligned)
    grid_f = _cdiv(F_aligned, tf_cap)
    tf = _round_up(_cdiv(F_aligned, grid_f), lane)
    F_pad = tf * grid_f

    # ---- operand prep (bf16 at the MXU boundary; zero padding is exact:
    # padded F columns/rows contribute 0, padded M rows are sliced off). ----
    x2 = x.reshape(M, D).astype(jnp.bfloat16)
    if M_pad != M:
        x2 = jnp.pad(x2, ((0, M_pad - M), (0, 0)))

    wi0_b = wi0.astype(jnp.bfloat16)
    wi1_b = wi1.astype(jnp.bfloat16)
    wo_b = wo.astype(jnp.bfloat16)
    if F_pad != F:
        wi0_b = jnp.pad(wi0_b, ((0, 0), (0, F_pad - F)))
        wi1_b = jnp.pad(wi1_b, ((0, 0), (0, F_pad - F)))
        wo_b = jnp.pad(wo_b, ((0, F_pad - F), (0, 0)))

    # Interleave wi_0 / wi_1 per F tile -> one (D, 2*tf) block per grid step.
    wi_packed = jnp.concatenate(
        [wi0_b.reshape(D, grid_f, tf), wi1_b.reshape(D, grid_f, tf)], axis=2
    ).reshape(D, 2 * F_pad)

    weight_bytes = 3 * D * F_pad * 2
    weight_reads = weight_bytes if grid_f == 1 else grid_m * weight_bytes
    cost = pl.CostEstimate(
        flops=6 * M_pad * D * F_pad,                  # three M*D*F matmuls
        transcendentals=M_pad * F_pad,                # tanh in GELU
        bytes_accessed=(M_pad * D * 2                 # x in (bf16)
                        + M_pad * D * jnp.dtype(out_dtype).itemsize
                        + weight_reads),
    )

    out = pl.pallas_call(
        _gated_ff_kernel,
        out_shape=jax.ShapeDtypeStruct((M_pad, D), out_dtype),
        grid_spec=pltpu.PrefetchScalarGridSpec(
            num_scalar_prefetch=0,
            grid=(grid_m, grid_f),
            in_specs=[
                pl.BlockSpec((tm, D), lambda i, j: (i, 0)),        # x tile
                pl.BlockSpec((D, 2 * tf), lambda i, j: (0, j)),    # [wi_0|wi_1] tile
                pl.BlockSpec((tf, D), lambda i, j: (j, 0)),        # wo tile
            ],
            out_specs=pl.BlockSpec((tm, D), lambda i, j: (i, 0)),
            scratch_shapes=[pltpu.VMEM((tm, D), jnp.float32)],
        ),
        compiler_params=pltpu.CompilerParams(
            dimension_semantics=("parallel", "arbitrary"),
            vmem_limit_bytes=int(budget)),
        cost_estimate=cost,
    )(x2, wi_packed, wo_b)

    if M_pad != M:
        out = out[:M]
    return out.reshape(orig_shape)


if __name__ == "__main__":
    model_dim, ff_dim = 32, 128
    batch, seq = 2, 8

    key = jax.random.PRNGKey(0)
    kx, k0, k1, k2 = jax.random.split(key, 4)
    x = jax.random.normal(kx, (batch, seq, model_dim), jnp.float32)
    wi0 = jax.random.normal(k0, (model_dim, ff_dim), jnp.float32) * 0.02
    wi1 = jax.random.normal(k1, (model_dim, ff_dim), jnp.float32) * 0.02
    wo = jax.random.normal(k2, (ff_dim, model_dim), jnp.float32) * 0.02

    out = t5_dense_gated_act_dense(x, wi0, wi1, wo)
    jax.block_until_ready(out)
    assert out.shape == (batch, seq, model_dim)

    # Sanity check vs. pure-JAX f32 reference (bf16 MXU inputs -> relaxed tol).
    ref = jnp.dot(_gelu_tanh(jnp.dot(x, wi0)) * jnp.dot(x, wi1), wo)
    max_err = float(jnp.max(jnp.abs(out - ref)))
    assert max_err < 5e-3, f"max abs err {max_err}"

    print("KERNEL_OK")
</pallas_src>

<mosaic_0001>
module attributes {stable_mosaic.version = 11 : i64} {
  func.func @_gated_ff_kernel(%arg0: i32, %arg1: i32, %arg2: memref<16x32xbf16, #tpu.memory_space<vmem>>, %arg3: memref<32x256xbf16, #tpu.memory_space<vmem>>, %arg4: memref<128x32xbf16, #tpu.memory_space<vmem>>, %arg5: memref<16x32xf32, #tpu.memory_space<vmem>>, %arg6: memref<16x32xf32, #tpu.memory_space<vmem>>) attributes {dimension_semantics = [#tpu.dimension_semantics<parallel>, #tpu.dimension_semantics<arbitrary>], iteration_bounds = array<i64: 1, 1>, scalar_prefetch = 0 : i64, scratch_operands = 1 : i64, tpu.core_type = #tpu.core_type<tc>, window_params = [{transform_indices = @transform_0, window_bounds = array<i64: 16, 32>}, {transform_indices = @transform_1, window_bounds = array<i64: 32, 256>}, {transform_indices = @transform_2, window_bounds = array<i64: 128, 32>}, {transform_indices = @transform_3, window_bounds = array<i64: 16, 32>}]} {
    %c0_i32 = arith.constant 0 : i32
    %0 = arith.cmpi eq, %arg1, %c0_i32 : i32
    %1 = arith.extui %0 : i1 to i32
    %c0_i32_0 = arith.constant 0 : i32
    %2 = arith.cmpi ne, %1, %c0_i32_0 : i32
    scf.if %2 {
      %cst_17 = arith.constant 0.000000e+00 : f32
      %31 = vector.broadcast %cst_17 : f32 to vector<16x32xf32>
      %c0_18 = arith.constant 0 : index
      %c0_19 = arith.constant 0 : index
      %32 = vector.load %arg6[%c0_18, %c0_19] : memref<16x32xf32, #tpu.memory_space<vmem>>, vector<16x32xf32>
      tpu.vector_store %arg6[%c0_18, %c0_19], %31 {strides = array<i32>} : memref<16x32xf32, #tpu.memory_space<vmem>>, vector<16x32xf32>,
    } else {
    }
    %c0 = arith.constant 0 : index
    %c0_1 = arith.constant 0 : index
    %3 = vector.load %arg2[%c0, %c0_1] : memref<16x32xbf16, #tpu.memory_space<vmem>>, vector<16x32xbf16>
    %c0_2 = arith.constant 0 : index
    %c0_3 = arith.constant 0 : index
    %4 = vector.load %arg3[%c0_2, %c0_3] : memref<32x256xbf16, #tpu.memory_space<vmem>>, vector<32x256xbf16>
    %cst = arith.constant dense<0.000000e+00> : vector<16x256xf32>
    %5 = tpu.matmul %3, %4, %cst {dimension_numbers = #tpu.dot_dimension_numbers<[1], [0], [0], [1], [0, 0, 1, 1], [], []>} : vector<16x32xbf16>, vector<32x256xbf16>, vector<16x256xf32> -> vector<16x256xf32>
    %6 = vector.extract_strided_slice %5 {offsets = [0, 0], sizes = [16, 128], strides = [1, 1]} : vector<16x256xf32> to vector<16x128xf32>
    %cst_4 = arith.constant 5.000000e-01 : f32
    %7 = vector.broadcast %cst_4 : f32 to vector<16x128xf32>
    %8 = arith.mulf %7, %6 : vector<16x128xf32>
    %cst_5 = arith.constant 4.471500e-02 : f32
    %9 = vector.broadcast %cst_5 : f32 to vector<16x128xf32>
    %10 = arith.mulf %9, %6 : vector<16x128xf32>
    %11 = arith.mulf %10, %6 : vector<16x128xf32>
    %12 = arith.mulf %11, %6 : vector<16x128xf32>
    %13 = arith.addf %6, %12 : vector<16x128xf32>
    %cst_6 = arith.constant 0.797884583 : f32
    %14 = vector.broadcast %cst_6 : f32 to vector<16x128xf32>
    %15 = arith.mulf %14, %13 : vector<16x128xf32>
    %16 = math.tanh %15 : vector<16x128xf32>
    %cst_7 = arith.constant 1.000000e+00 : f32
    %17 = vector.broadcast %cst_7 : f32 to vector<16x128xf32>
    %18 = arith.addf %17, %16 : vector<16x128xf32>
    %19 = arith.mulf %8, %18 : vector<16x128xf32>
    %20 = vector.extract_strided_slice %5 {offsets = [0, 128], sizes = [16, 128], strides = [1, 1]} : vector<16x256xf32> to vector<16x128xf32>
    %21 = arith.mulf %19, %20 : vector<16x128xf32>
    %c0_8 = arith.constant 0 : index
    %c0_9 = arith.constant 0 : index
    %22 = vector.load %arg6[%c0_8, %c0_9] : memref<16x32xf32, #tpu.memory_space<vmem>>, vector<16x32xf32>
    %23 = arith.truncf %21 : vector<16x128xf32> to vector<16x128xbf16>
    %c0_10 = arith.constant 0 : index
    %c0_11 = arith.constant 0 : index
    %24 = vector.load %arg4[%c0_10, %c0_11] : memref<128x32xbf16, #tpu.memory_space<vmem>>, vector<128x32xbf16>
    %cst_12 = arith.constant dense<0.000000e+00> : vector<16x32xf32>
    %25 = tpu.matmul %23, %24, %cst_12 {dimension_numbers = #tpu.dot_dimension_numbers<[1], [0], [0], [1], [0, 0, 1, 1], [], []>} : vector<16x128xbf16>, vector<128x32xbf16>, vector<16x32xf32> -> vector<16x32xf32>
    %26 = arith.addf %22, %25 : vector<16x32xf32>
    %c0_13 = arith.constant 0 : index
    %c0_14 = arith.constant 0 : index
    %27 = vector.load %arg6[%c0_13, %c0_14] : memref<16x32xf32, #tpu.memory_space<vmem>>, vector<16x32xf32>
    tpu.vector_store %arg6[%c0_13, %c0_14], %26 {strides = array<i32>} : memref<16x32xf32, #tpu.memory_space<vmem>>, vector<16x32xf32>,
    %c0_i32_15 = arith.constant 0 : i32
    %28 = arith.cmpi eq, %arg1, %c0_i32_15 : i32
    %29 = arith.extui %28 : i1 to i32
    %c0_i32_16 = arith.constant 0 : i32
    %30 = arith.cmpi ne, %29, %c0_i32_16 : i32
    scf.if %30 {
      %c0_17 = arith.constant 0 : index
      %c0_18 = arith.constant 0 : index
      %31 = vector.load %arg6[%c0_17, %c0_18] : memref<16x32xf32, #tpu.memory_space<vmem>>, vector<16x32xf32>
      %c0_19 = arith.constant 0 : index
      %c0_20 = arith.constant 0 : index
      %32 = vector.load %arg5[%c0_19, %c0_20] : memref<16x32xf32, #tpu.memory_space<vmem>>, vector<16x32xf32>
      tpu.vector_store %arg5[%c0_19, %c0_20], %31 {strides = array<i32>} : memref<16x32xf32, #tpu.memory_space<vmem>>, vector<16x32xf32>,
    } else {
    }
    return
  }
  func.func @transform_0(%arg0: i32, %arg1: i32) -> (i32, i32) {
    %c0_i32 = arith.constant 0 : i32
    %c0_i32_0 = arith.constant 0 : i32
    return %arg0, %c0_i32 : i32, i32
  }
  func.func @transform_1(%arg0: i32, %arg1: i32) -> (i32, i32) {
    %c0_i32 = arith.constant 0 : i32
    %c0_i32_0 = arith.constant 0 : i32
    return %c0_i32, %arg1 : i32, i32
  }
  func.func @transform_2(%arg0: i32, %arg1: i32) -> (i32, i32) {
    %c0_i32 = arith.constant 0 : i32
    %c0_i32_0 = arith.constant 0 : i32
    return %arg1, %c0_i32 : i32, i32
  }
  func.func @transform_3(%arg0: i32, %arg1: i32) -> (i32, i32) {
    %c0_i32 = arith.constant 0 : i32
    %c0_i32_0 = arith.constant 0 : i32
    return %arg0, %c0_i32 : i32, i32
  }
}

</mosaic_0001>

<bundles_post_ra>
// kernel: tpu_custom_call.1
= control target key start
LH: loop header
LB: loop body
LE: loop exit
PB: predicated region body
PF: predicated region fallthrough
CT: control target
= control target key end

     0   :  { %s403_s0 = inlined_call_operand.vmem [shape: bf16[16,32], index: 0, kind: input, shape index: {}]   ;;  %s404_s1 = inlined_call_operand.vmem [shape: bf16[32,256], index: 1, kind: input, shape index: {}]   ;;  %s405_s2 = inlined_call_operand.vmem [shape: bf16[128,32], index: 2, kind: input, shape index: {}]   ;;  %s406_s3 = inlined_call_operand.hbm [shape: f32[16,32], index: 3, kind: output, shape index: {}]  }
   0x1   :  { %v230_v0 = vld [vmem:[%s404_s1 + $0x10] sm:$0xf]  ;;  %v274_v1 = vld [vmem:[%s404_s1 + $0x14] sm:$0xf0]  ;;  %v222_v2 = vld [vmem:[%s404_s1] sm:$0xf] }
   0x2   :  { %v231_v3 = vor.u32 %v274_v1, %v230_v0  ;;  %v272_v4 = vld [vmem:[%s404_s1 + $0x4] sm:$0xf0]  ;;  %v273_v5 = vld [vmem:[%s404_s1 + $0x14] sm:$0xf]  ;;  %v232_v6 = vld [vmem:[%s404_s1 + $0x18] sm:$0xf0] }
   0x3   :  { %v271_v7 = vld [vmem:[%s404_s1 + $0x4] sm:$0xf]  ;;  %v224_v8 = vld [vmem:[%s404_s1 + $0x8] sm:$0xf0]  ;;  %v223_v9 = vor.u32 %v272_v4, %v222_v2  ;;  %v235_v10 = vor.u32 %v273_v5, %v232_v6 }
   0x4   :  { %64 = vmatpush.bf16.msra.mxu0 %v231_v3 }
   0x5   :  { %8 = vsyncpa [#allocation4], 0  ;;  %78 = vmatpush.bf16.msra.mxu1 %v235_v10  ;;  %v227_v11 = vor.u32 %v271_v7, %v224_v8  ;;  %v270_v12 = vld [vmem:[%s403_s0] sm:$0xff]  ;;  %vm20_vm0 = vcmask 261120   ;;  %v282_v13 = vld [vmem:[%s405_s2 + $0x38] sm:$0xff]  ;;  %v317_v24 = vmov 0.0  }
   0x6   :  { %173 = vmatpush.bf16.msra.mxu2 %v282_v13  ;;  %v281_v14 = vld [vmem:[%s405_s2 + $0x30] sm:$0xff]  ;;  %v280_v15 = vld [vmem:[%s405_s2 + $0x28] sm:$0xff]  ;;  %v279_v16 = vld [vmem:[%s405_s2 + $0x20] sm:$0xff]  ;;  %21 = vst.msk [vmem:[#allocation2] sm:$0xff] %vm20_vm0, %v317_v24  ;;  %s204_s20 = sshll.u32 %s406_s3, 4  ;;  %s319_s21 = smov 128   ;;  %s205_s20 = int_to_ptr.hbm [resolvable:$true] %s204_s20 }
   0x7   :  { %v278_v17 = vld [vmem:[%s405_s2 + $0x18] sm:$0xff]  ;;  %v277_v18 = vld [vmem:[%s405_s2 + $0x10] sm:$0xff]  ;;  %v276_v19 = vld [vmem:[%s405_s2 + $0x8] sm:$0xff]  ;;  %22 = vst.msk [vmem:[#allocation2 + $0x8] sm:$0xff] %vm20_vm0, %v317_v24  ;;  %s320_s22 = smov 8  }
   0x8   :  { %65 = vmatpush.bf16.msra.mxu0 %v223_v9  ;;  %v275_v20 = vld [vmem:[%s405_s2] sm:$0xff]  ;;  %s318_s2 = smov [#allocation3]  }
   0x9   :  { %79 = vmatpush.bf16.msra.mxu1 %v227_v11  ;;  %s202_s17 = sshll.u32 %s318_s2, 4  ;;  %s203_s17 = int_to_ptr.vmem [resolvable:$true] %s202_s17 }
   0xa   :  { %174 = vmatpush.bf16.msra.mxu2 %v281_v14 }
   0xb   :  { %236 = vmatmul.msk.bf16.vlgmr.msra.gmra.mxu0 %vm20_vm0, %v270_v12 }
   0xc   :  { %237 = vmatmul.msk.bf16.vlgmr.msra.gmra.mxu1 %vm20_vm0, %v270_v12 }
   0xd   :  { %v106_v47 = vld [vmem:[#allocation2] sm:$0xff] }
   0xe   :  { %175 = vmatpush.bf16.msra.mxu2 %v280_v15  ;;  %v107_v50 = vld [vmem:[#allocation2 + $0x8] sm:$0xff] }
  0x12   :  { %176 = vmatpush.bf16.msra.mxu2 %v279_v16 }
  0x16   :  { %177 = vmatpush.bf16.msra.mxu2 %v278_v17 }
  0x1a   :  { %178 = vmatpush.bf16.msra.mxu2 %v277_v18 }
  0x1e   :  { %179 = vmatpush.bf16.msra.mxu2 %v276_v19 }
  0x22   :  { %180 = vmatpush.bf16.msra.mxu2 %v275_v20 }
  0x88   :  { %v67_v21 = vpop.f32.mrf.mxu0 }
  0x89   :  { %v88_v22 = vmul.f32 0.044715, %v67_v21  ;;  %v81_v35 = vpop.f32.mrf.mxu1  ;;  %v86_v37 = vmul.f32 0.5, %v67_v21 }
  0x8b   :  { %v90_v23 = vmul.f32 %v88_v22, %v67_v21 }
  0x8d   :  { %v92_v25 = vmul.f32 %v90_v23, %v67_v21 }
  0x8f   :  { %v94_v26 = vadd.f32 %v92_v25, %v67_v21 }
  0x90   :  { %v69_v27 = vpop.f32.mrf.mxu0 }
  0x91   :  { %v89_v28 = vmul.f32 0.044715, %v69_v27  ;;  %v96_v29 = vmul.f32 0.7978846, %v94_v26  ;;  %v87_v40 = vmul.f32 0.5, %v69_v27  ;;  %v83_v43 = vpop.f32.mrf.mxu1 }
  0x93   :  { %v91_v30 = vmul.f32 %v89_v28, %v69_v27  ;;  %287 = vtanh.f32 %v96_v29 }
  0x95   :  { %v93_v31 = vmul.f32 %v91_v30, %v69_v27 }
  0x97   :  { %v95_v32 = vadd.f32 %v93_v31, %v69_v27 }
  0x99   :  { %v97_v33 = vmul.f32 0.7978846, %v95_v32  ;;  %v288_v34 = vpop.eup %287 }
  0x9a   :  { %v100_v36 = vadd.f32 1.0, %v288_v34 }
  0x9b   :  { %289 = vtanh.f32 %v97_v33 }
  0x9c   :  { %v102_v39 = vmul.f32 %v100_v36, %v86_v37 }
  0x9e   :  { %v104_v44 = vmul.f32 %v102_v39, %v81_v35 }
  0xa1   :  { %v290_v38 = vpop.eup %289 }
  0xa2   :  { %v101_v41 = vadd.f32 1.0, %v290_v38 }
  0xa4   :  { %v103_v42 = vmul.f32 %v101_v41, %v87_v40 }
  0xa6   :  { %v105_v45 = vmul.f32 %v103_v42, %v83_v43 }
  0xa8   :  { %v108_v46 = vpack.c.bf16 %v105_v45, %v104_v44 }
  0xaa   :  { %181 = vmatmul.bf16.vlgmr.msra.gmra.mxu2 %v108_v46 }
 0x12d   :  { %v182_v48 = vpop.f32.mrf.mxu2 }
 0x12e   :  { %v187_v49 = vadd.f32 %v182_v48, %v106_v47 }
 0x130   :  { %189 = vst.msk [vmem:[#allocation2] sm:$0xff] %vm20_vm0, %v187_v49 }
 0x135   :  { %v184_v51 = vpop.f32.mrf.mxu2 }
 0x136   :  { %v188_v52 = vadd.f32 %v184_v51, %v107_v50 }
 0x137   :  { %v194_v53 = vld [vmem:[#allocation2] sm:$0xff] }
 0x138   :  { %190 = vst.msk [vmem:[#allocation2 + $0x8] sm:$0xff] %vm20_vm0, %v188_v52 }
 0x139   :  { %196 = vst.msk [vmem:[#allocation3] sm:$0xff] %vm20_vm0, %v194_v53 }
 0x13f   :  { %v195_v54 = vld [vmem:[#allocation2 + $0x8] sm:$0xff] }
 0x140   :  { %197 = vst.msk [vmem:[#allocation3 + $0x8] sm:$0xff] %vm20_vm0, %v195_v54 }
 0x141   :  { %210 = dma.vmem_to_hbm [thread:$0]  %s203_s17, 256, %s205_s20, [#allocation4], %s319_s21, %s319_s21, %s320_s22  }
 0x142   :  { %315 = dma.done.wait [#allocation4], 256  }
 0x143   :  { %316 = vsyncadd [#allocation4], 4294967040 }
 0x144   :  { %215 = vsyncpa [#allocation4], 1 }

</bundles_post_ra>
